<compile_context>
chip_gen: v7x
topology: tpu7x:2x2x1
jax: 0.10.0
libtpu: 0.0.40
codegen_flags: <defaults>
</compile_context>

<pallas_src>
import jax
import jax.numpy as jnp
from jax.experimental import pallas as pl
from jax.experimental.pallas import tpu as pltpu

C, H, W = 3, 64, 64
_IMG_ELEMS = C * H * W                    # 12288
_LANES = 512                              # lane-dense last dim (multiple of 128)
_ROWS_PER_IMG = _IMG_ELEMS // _LANES      # 24 rows / image (multiple of 8)

_MAX_BLOCK_ROWS = 1024    # 1024x512 block: 6 MiB double-buffered VMEM (safe on v5e/v6e/v7x)
_MIN_GRID_STEPS = 4       # keep DMA pipelining + both v7x TensorCores busy
_SINGLE_BLOCK_ROWS = 64   # below this, grid/pipeline overhead dominates; one resident block


def _cast_kernel(x_ref, o_ref):
    # Elementwise cast to float32 (the whole kernel is a bandwidth-bound copy).
    o_ref[...] = x_ref[...].astype(jnp.float32)


def _choose_block_rows(rows):
    """Fixed-size blocking: multiple of 8 rows, <= _MAX_BLOCK_ROWS, and for
    non-trivial inputs at least _MIN_GRID_STEPS grid steps (ragged tail is
    masked by Pallas)."""
    if rows <= _SINGLE_BLOCK_ROWS:
        return rows                        # rows = 24*n, always a multiple of 8
    target = max(8, (rows // _MIN_GRID_STEPS) // 8 * 8)
    return min(_MAX_BLOCK_ROWS, target)


def animal_student_net_forward(x):
    """Equivalent of AnimalStudentNet.forward: view(-1, 3, 64, 64) + .float()."""
    total = x.size
    assert total % _IMG_ELEMS == 0, "input size must be a multiple of 3*64*64"
    n = total // _IMG_ELEMS

    if x.dtype == jnp.float32:
        # .float() is a no-op for f32 inputs: skip the HBM read+write entirely.
        return jnp.reshape(x, (n, C, H, W))

    rows = n * _ROWS_PER_IMG               # 24*n, always a multiple of 8

    # Glue: flatten to a lane-dense 2D slab (no data movement for a
    # contiguous input; this is the `.contiguous().view(...)` part).
    x2 = jnp.reshape(x, (rows, _LANES))

    block_rows = _choose_block_rows(rows)
    grid = (pl.cdiv(rows, block_rows),)

    in_bytes = rows * _LANES * jnp.dtype(x.dtype).itemsize
    out_bytes = rows * _LANES * 4

    out2 = pl.pallas_call(
        _cast_kernel,
        out_shape=jax.ShapeDtypeStruct((rows, _LANES), jnp.float32),
        grid_spec=pltpu.PrefetchScalarGridSpec(
            num_scalar_prefetch=0,
            grid=grid,
            in_specs=[pl.BlockSpec((block_rows, _LANES), lambda i: (i, 0))],
            out_specs=pl.BlockSpec((block_rows, _LANES), lambda i: (i, 0)),
        ),
        compiler_params=pltpu.CompilerParams(
            dimension_semantics=("parallel",),
        ),
        cost_estimate=pl.CostEstimate(
            flops=0, transcendentals=0, bytes_accessed=in_bytes + out_bytes),
    )(x2)

    # Back to the NCHW view the module returns.
    return jnp.reshape(out2, (n, C, H, W))


if __name__ == "__main__":
    key = jax.random.PRNGKey(0)

    # Small input (batch=2): single resident block path. bf16 so the .float()
    # cast is meaningful. Flat shape exercises the view(-1, 3, 64, 64).
    x_small = jax.random.normal(key, (2, C * H * W), dtype=jnp.bfloat16)
    y_small = jax.block_until_ready(animal_student_net_forward(x_small))
    ref_small = jnp.reshape(x_small, (-1, C, H, W)).astype(jnp.float32)
    assert y_small.shape == (2, C, H, W) and y_small.dtype == jnp.float32
    assert jnp.array_equal(y_small, ref_small)

    # Medium input (batch=13): multi-step grid with a ragged (masked) tail
    # block — exercises the cdiv/pipelined path.
    x_med = jax.random.normal(key, (13, C, H, W), dtype=jnp.bfloat16)
    y_med = jax.block_until_ready(animal_student_net_forward(x_med))
    ref_med = jnp.reshape(x_med, (-1, C, H, W)).astype(jnp.float32)
    assert y_med.shape == (13, C, H, W) and y_med.dtype == jnp.float32
    assert jnp.array_equal(y_med, ref_med)

    # Already-float32 input: early-out path (no kernel launch).
    x_f32 = jax.random.normal(key, (2, C * H * W), dtype=jnp.float32)
    y_f32 = jax.block_until_ready(animal_student_net_forward(x_f32))
    assert y_f32.shape == (2, C, H, W) and y_f32.dtype == jnp.float32
    assert jnp.array_equal(y_f32, jnp.reshape(x_f32, (-1, C, H, W)))

    print("KERNEL_OK")
</pallas_src>

<mosaic_0001>
module attributes {stable_mosaic.version = 11 : i64} {
  func.func @_cast_kernel(%arg0: i32, %arg1: memref<48x512xbf16, #tpu.memory_space<vmem>>, %arg2: memref<48x512xf32, #tpu.memory_space<vmem>>) attributes {dimension_semantics = [#tpu.dimension_semantics<parallel>], iteration_bounds = array<i64: 1>, scalar_prefetch = 0 : i64, scratch_operands = 0 : i64, tpu.core_type = #tpu.core_type<tc>, window_params = [{transform_indices = @transform_0, window_bounds = array<i64: 48, 512>}, {transform_indices = @transform_1, window_bounds = array<i64: 48, 512>}]} {
    %c0 = arith.constant 0 : index
    %c0_0 = arith.constant 0 : index
    %0 = vector.load %arg1[%c0, %c0_0] : memref<48x512xbf16, #tpu.memory_space<vmem>>, vector<48x512xbf16>
    %1 = arith.extf %0 : vector<48x512xbf16> to vector<48x512xf32>
    %c0_1 = arith.constant 0 : index
    %c0_2 = arith.constant 0 : index
    %2 = vector.load %arg2[%c0_1, %c0_2] : memref<48x512xf32, #tpu.memory_space<vmem>>, vector<48x512xf32>
    tpu.vector_store %arg2[%c0_1, %c0_2], %1 {strides = array<i32>} : memref<48x512xf32, #tpu.memory_space<vmem>>, vector<48x512xf32>,
    return
  }
  func.func @transform_0(%arg0: i32) -> (i32, i32) {
    %c0_i32 = arith.constant 0 : i32
    %c0_i32_0 = arith.constant 0 : i32
    return %arg0, %c0_i32 : i32, i32
  }
  func.func @transform_1(%arg0: i32) -> (i32, i32) {
    %c0_i32 = arith.constant 0 : i32
    %c0_i32_0 = arith.constant 0 : i32
    return %arg0, %c0_i32 : i32, i32
  }
}

</mosaic_0001>

<bundles_post_ra>
// kernel: tpu_custom_call.1
= control target key start
LH: loop header
LB: loop body
LE: loop exit
PB: predicated region body
PF: predicated region fallthrough
CT: control target
= control target key end

     0   :  { %6 = vsyncpa [#allocation3], 0  ;;  %s194_s0 = inlined_call_operand.hbm [shape: bf16[48,512], index: 0, kind: input, shape index: {}]   ;;  %s195_s1 = inlined_call_operand.hbm [shape: f32[48,512], index: 1, kind: output, shape index: {}]  }
   0x1   :  { %7 = vsyncpa [#allocation4], 0  ;;  %s154_s6 = smov [#allocation2]   ;;  %s106_s10 = scalar_lea.hbm %s194_s0, 1536 }
   0x2   :  { %s13_s7 = sshll.u32 %s154_s6, 4  ;;  %p107_p0 = scmp.ne.s32.totalorder %s194_s0, %s106_s10  ;;  %s14_s7 = int_to_ptr.vmem [resolvable:$true] %s13_s7 }
   0x3   :  { %p110_p1 = scmp.lt.u32.totalorder %s106_s10, %s194_s0 }
   0x5   :  { %p112_p2 = pnand %p110_p1, %p107_p0 }
   0x7   :  { %115 = shalt.err (!%p112_p2)
}
   0x8   :  { %s116_s15 = scalar_lea.vmem %s14_s7, 1536  ;;  %p121_p4 = scmp.lt.s32.totalorder %s14_s7, %s14_s7 }
   0x9   :  { %p117_p3 = scmp.ne.s32.totalorder %s14_s7, %s116_s15  ;;  %p122_p5 = scmp.lt.s32.totalorder %s116_s15, %s116_s15 }
   0xb   :  { %p123_p6 = por %p122_p5, %p121_p4 }
   0xd   :  { %p124_p7 = pnand %p123_p6, %p117_p3 }
   0xf   :  { %127 = shalt.err (!%p124_p7)
}
  0x10   :  { %s155_s16 = smov 256   ;;  %s156_s17 = smov 16  }
  0x11   :  { %19 = dma.hbm_to_vmem [thread:$0]  %s194_s0, 1536, %s14_s7, [#allocation3], %s155_s16, %s155_s16, %s156_s17  }
  0x12   :  { %150 = dma.done.wait [#allocation3], 1536  }
  0x13   :  { %151 = vsyncadd [#allocation3], 4294965760  ;;  %v23_v0 = vld [vmem:[#allocation2] sm:$0xff]  ;;  %v24_v1 = vld [vmem:[#allocation2 + $0x8] sm:$0xff]  ;;  %s157_s0 = smov [#allocation5]  }
  0x14   :  { %v25_v2 = vld [vmem:[#allocation2 + $0x10] sm:$0xff]  ;;  %v35_v3 = vunpack.c.l.bf16 %v23_v0  ;;  %v36_v4 = vunpack.c.h.bf16 %v23_v0  ;;  %v37_v5 = vunpack.c.l.bf16 %v24_v1  ;;  %v38_v6 = vunpack.c.h.bf16 %v24_v1  ;;  %v26_v7 = vld [vmem:[#allocation2 + $0x18] sm:$0xff]  ;;  %v27_v8 = vld [vmem:[#allocation2 + $0x20] sm:$0xff]  ;;  %s88_s20 = sshll.u32 %s157_s0, 4  ;;  %s89_s20 = int_to_ptr.vmem [resolvable:$true] %s88_s20 }
  0x15   :  { %v28_v9 = vld [vmem:[#allocation2 + $0x28] sm:$0xff]  ;;  %v39_v10 = vunpack.c.l.bf16 %v25_v2  ;;  %v40_v11 = vunpack.c.h.bf16 %v25_v2  ;;  %v41_v12 = vunpack.c.l.bf16 %v26_v7  ;;  %v42_v13 = vunpack.c.h.bf16 %v26_v7  ;;  %v29_v14 = vld [vmem:[#allocation2 + $0x30] sm:$0xff]  ;;  %v30_v15 = vld [vmem:[#allocation2 + $0x38] sm:$0xff]  ;;  %s128_s21 = scalar_lea.vmem %s89_s20, 3072  ;;  %p133_p9 = scmp.lt.s32.totalorder %s89_s20, %s89_s20 }
  0x16   :  { %v31_v16 = vld [vmem:[#allocation2 + $0x40] sm:$0xff]  ;;  %59 = vst [vmem:[#allocation5] sm:$0xff] %v35_v3  ;;  %60 = vst [vmem:[#allocation5 + $0x8] sm:$0xff] %v36_v4  ;;  %v43_v17 = vunpack.c.l.bf16 %v27_v8  ;;  %v44_v18 = vunpack.c.h.bf16 %v27_v8  ;;  %v45_v19 = vunpack.c.l.bf16 %v28_v9  ;;  %v46_v20 = vunpack.c.h.bf16 %v28_v9  ;;  %v32_v21 = vld [vmem:[#allocation2 + $0x48] sm:$0xff]  ;;  %p129_p8 = scmp.ne.s32.totalorder %s89_s20, %s128_s21  ;;  %p134_p10 = scmp.lt.s32.totalorder %s128_s21, %s128_s21 }
  0x17   :  { %61 = vst [vmem:[#allocation5 + $0x10] sm:$0xff] %v37_v5  ;;  %62 = vst [vmem:[#allocation5 + $0x18] sm:$0xff] %v38_v6  ;;  %v33_v22 = vld [vmem:[#allocation2 + $0x50] sm:$0xff]  ;;  %v34_v23 = vld [vmem:[#allocation2 + $0x58] sm:$0xff]  ;;  %v47_v24 = vunpack.c.l.bf16 %v29_v14  ;;  %v48_v25 = vunpack.c.h.bf16 %v29_v14  ;;  %v49_v26 = vunpack.c.l.bf16 %v30_v15  ;;  %v50_v27 = vunpack.c.h.bf16 %v30_v15 }
  0x18   :  { %63 = vst [vmem:[#allocation5 + $0x20] sm:$0xff] %v39_v10  ;;  %64 = vst [vmem:[#allocation5 + $0x28] sm:$0xff] %v40_v11  ;;  %v51_v28 = vunpack.c.l.bf16 %v31_v16  ;;  %v52_v29 = vunpack.c.h.bf16 %v31_v16  ;;  %v53_v30 = vunpack.c.l.bf16 %v32_v21  ;;  %v54_v31 = vunpack.c.h.bf16 %v32_v21  ;;  %p135_p11 = por %p134_p10, %p133_p9 }
  0x19   :  { %65 = vst [vmem:[#allocation5 + $0x30] sm:$0xff] %v41_v12  ;;  %66 = vst [vmem:[#allocation5 + $0x38] sm:$0xff] %v42_v13  ;;  %v55_v32 = vunpack.c.l.bf16 %v33_v22  ;;  %v56_v33 = vunpack.c.h.bf16 %v33_v22  ;;  %v57_v34 = vunpack.c.l.bf16 %v34_v23  ;;  %v58_v35 = vunpack.c.h.bf16 %v34_v23 }
  0x1a   :  { %67 = vst [vmem:[#allocation5 + $0x40] sm:$0xff] %v43_v17  ;;  %68 = vst [vmem:[#allocation5 + $0x48] sm:$0xff] %v44_v18  ;;  %p136_p12 = pnand %p135_p11, %p129_p8 }
  0x1b   :  { %69 = vst [vmem:[#allocation5 + $0x50] sm:$0xff] %v45_v19  ;;  %70 = vst [vmem:[#allocation5 + $0x58] sm:$0xff] %v46_v20 }
  0x1c   :  { %71 = vst [vmem:[#allocation5 + $0x60] sm:$0xff] %v47_v24  ;;  %72 = vst [vmem:[#allocation5 + $0x68] sm:$0xff] %v48_v25 }
  0x1d   :  { %73 = vst [vmem:[#allocation5 + $0x70] sm:$0xff] %v49_v26  ;;  %74 = vst [vmem:[#allocation5 + $0x78] sm:$0xff] %v50_v27 }
  0x1e   :  { %75 = vst [vmem:[#allocation5 + $0x80] sm:$0xff] %v51_v28  ;;  %76 = vst [vmem:[#allocation5 + $0x88] sm:$0xff] %v52_v29 }
  0x1f   :  { %77 = vst [vmem:[#allocation5 + $0x90] sm:$0xff] %v53_v30  ;;  %78 = vst [vmem:[#allocation5 + $0x98] sm:$0xff] %v54_v31 }
  0x20   :  { %79 = vst [vmem:[#allocation5 + $0xa0] sm:$0xff] %v55_v32  ;;  %80 = vst [vmem:[#allocation5 + $0xa8] sm:$0xff] %v56_v33 }
  0x21   :  { %81 = vst [vmem:[#allocation5 + $0xb0] sm:$0xff] %v57_v34  ;;  %82 = vst [vmem:[#allocation5 + $0xb8] sm:$0xff] %v58_v35 }
  0x22   :  { %139 = shalt.err (!%p136_p12)
}
  0x23   :  { %s140_s24 = scalar_lea.hbm %s195_s1, 3072 }
  0x24   :  { %p141_p13 = scmp.ne.s32.totalorder %s195_s1, %s140_s24  ;;  %p144_p0 = scmp.lt.u32.totalorder %s140_s24, %s195_s1 }
  0x26   :  { %p146_p1 = pnand %p144_p0, %p141_p13 }
  0x28   :  { %149 = shalt.err (!%p146_p1)
}
  0x29   :  { %s158_s29 = smov 512   ;;  %s159_s30 = smov 32  }
  0x2a   :  { %94 = dma.vmem_to_hbm [thread:$0]  %s89_s20, 3072, %s195_s1, [#allocation4], %s158_s29, %s158_s29, %s159_s30  }
  0x2b   :  { %152 = dma.done.wait [#allocation4], 3072  }
  0x2c   :  { %153 = vsyncadd [#allocation4], 4294964224 }
  0x2d   :  { %98 = vsyncpa [#allocation3], 1 }
  0x2e   :  { %99 = vsyncpa [#allocation4], 1 }

</bundles_post_ra>
